<compile_context>
chip_gen: v5e
topology: v5e:2x2
jax: 0.10.0
libtpu: 0.0.40
codegen_flags: <defaults>
</compile_context>

<pallas_src>
import functools

import numpy as np
import jax
import jax.numpy as jnp
from jax.experimental import pallas as pl
from jax.experimental.pallas import tpu as pltpu


def _shake_basic_block_kernel(x_ref, t1_ref, t2_ref, sc_ref, b1_ref, b3_ref,
                              out_ref, h1p_ref, *, mxu_dtype):
    # x_ref  : (H+2, W*Cin)        raw input, vertically zero-padded, width-packed
    # t1_ref : (3, W*Cin, W*Cout)  conv1 width-Toeplitz taps (BN1/BN2 scale folded)
    # t2_ref : (3, W*Cout, W*Cout) conv2 width-Toeplitz taps (BN3 scale*shake folded)
    # sc_ref : (W*Cin, W*Cout)     0/1 channel-scatter matrix for the shortcut
    # b1_ref : (H, W*Cout)         conv1(BN1 shift) + BN2 shift, precomputed exactly
    # b3_ref : (1, W*Cout)         BN3 shift * shake, tiled over W
    # out_ref: (H, W*Cout)         lane-dense output slab
    # h1p_ref: (H+2, W*Cout)       VMEM scratch: conv2 input with vertical zero pad
    H, WCo = out_ref.shape

    # ---- conv1 (+BN1, +BN2-scale folded): 3 vertical-tap MXU matmuls.
    #      Horizontal taps and horizontal zero padding live in the Toeplitz RHS,
    #      so LHS is just an offset row-slice of the VMEM block (no relayouts). ----
    acc1 = b1_ref[...]
    for di in range(3):
        lhs = x_ref[di:di + H, :].astype(mxu_dtype)
        acc1 = acc1 + jnp.dot(lhs, t1_ref[di], preferred_element_type=jnp.float32)
    h1 = jnp.maximum(acc1, 0.0)                      # BN2-shift already in b1; ReLU in f32

    # ---- vertical zero pad for conv2: two full-lane-width row stores + interior.
    #      (No masked column stores; re-zeroing every step is trivially cheap and
    #       stays correct when the grid is split across TensorCores.) ----
    zero_row = jnp.zeros((1, WCo), mxu_dtype)
    h1p_ref[0:1, :] = zero_row
    h1p_ref[H + 1:H + 2, :] = zero_row
    h1p_ref[1:H + 1, :] = h1.astype(mxu_dtype)

    # ---- conv2 (+BN3-scale*shake folded): 3 vertical-tap MXU matmuls ----
    acc2 = jnp.dot(h1p_ref[0:H, :], t2_ref[0], preferred_element_type=jnp.float32)
    for di in range(1, 3):
        acc2 = acc2 + jnp.dot(h1p_ref[di:di + H, :], t2_ref[di],
                              preferred_element_type=jnp.float32)

    # ---- shortcut: raw x scattered into the first Cin of each Cout channel group
    #      (== torch.cat([x, zeros], dim=1)), as one small exact f32 matmul. ----
    short = jnp.dot(x_ref[1:H + 1, :], sc_ref[...], preferred_element_type=jnp.float32)

    out_ref[...] = (acc2 + b3_ref[...] + short).astype(out_ref.dtype)


def _width_toeplitz(w_hwio, W):
    """Fold the 3 horizontal taps + horizontal 'same' zero padding into a matrix.

    w_hwio: (3, 3, Ci, Co).  Returns T: (3, W*Ci, W*Co) with
      T[di][jc*Ci + ci, j*Co + co] = w[di, dj, ci, co]  where dj = jc - j + 1,
    entries with j + dj - 1 outside [0, W) omitted (== zero padding).
    Built with elementwise multiply + reduce-sum only (exact in f32).
    """
    Ci, Co = int(w_hwio.shape[2]), int(w_hwio.shape[3])
    E = np.zeros((3, W, W), np.float32)          # E[dj, jc, j] = 1 iff jc == j + dj - 1
    for dj in range(3):
        j = np.arange(W)
        jc = j + dj - 1
        ok = (jc >= 0) & (jc < W)
        E[dj, jc[ok], j[ok]] = 1.0
    prod = E[None, :, :, None, :, None] * w_hwio[:, :, None, :, None, :]
    return prod.sum(axis=1).reshape(3, W * Ci, W * Co)   # (di, jc, ci, j, co) flattened


def shake_basic_block(x_nchw, w1, w2, bn1s, bn1b, bn2s, bn2b, bn3s, bn3b,
                      *, stride=1, p_shakedrop=0.5, mxu_dtype=jnp.float32):
    """Forward pass of ShakeBasicBlock (inference). x_nchw: (N, Cin, H, W) float32."""
    # TODO(synk): stride=2 downsampled path not implemented in-kernel.
    assert stride == 1, "only the stride=1 (non-downsampled) path is implemented"

    x = jnp.transpose(x_nchw, (0, 2, 3, 1)).astype(jnp.float32)   # NCHW -> NHWC
    N, H, W, Cin = x.shape
    Cout = int(w2.shape[-1])
    assert Cout >= Cin, "ShakeBasicBlock pads channels up; requires out_ch >= in_ch"
    WCi, WCo = W * Cin, W * Cout
    shake = float(1.0 - p_shakedrop)

    w1_f32 = w1.astype(jnp.float32)
    w2_f32 = w2.astype(jnp.float32)
    bn1s = bn1s.astype(jnp.float32); bn1b = bn1b.astype(jnp.float32)
    bn2s = bn2s.astype(jnp.float32); bn2b = bn2b.astype(jnp.float32)
    bn3s = bn3s.astype(jnp.float32); bn3b = bn3b.astype(jnp.float32)

    # ---- host-side constant folding (all exact f32: elementwise + reduce only) ----
    # BN1 scale and BN2 scale into conv1; BN3 scale * shake into conv2.
    w1f = w1_f32 * bn1s.reshape(1, 1, Cin, 1) * bn2s.reshape(1, 1, 1, Cout)
    w2f = w2_f32 * (bn3s * shake).reshape(1, 1, 1, Cout)
    T1 = _width_toeplitz(w1f, W)                                   # (3, W*Cin, W*Cout)
    T2 = _width_toeplitz(w2f, W)                                   # (3, W*Cout, W*Cout)

    # bias map = BN2scale * conv_{w1}(BN1shift over the interior, zero-padded) + BN2shift
    wsum = (w1_f32 * bn1b.reshape(1, 1, Cin, 1)).sum(axis=2)       # (3, 3, Cout)
    rowmask = np.zeros((H, 3), np.float32)
    colmask = np.zeros((W, 3), np.float32)
    for d in range(3):
        rowmask[:, d] = ((np.arange(H) + d - 1 >= 0) & (np.arange(H) + d - 1 < H))
        colmask[:, d] = ((np.arange(W) + d - 1 >= 0) & (np.arange(W) + d - 1 < W))
    tmp = (rowmask[:, :, None, None] * wsum[None, :, :, :]).sum(axis=1)       # (H, 3, Cout)
    bias_sp = (tmp[:, None, :, :] * colmask[None, :, :, None]).sum(axis=2)    # (H, W, Cout)
    bias1 = (bias_sp * bn2s.reshape(1, 1, Cout)
             + bn2b.reshape(1, 1, Cout)).reshape(H, WCo)                      # (H, W*Cout)
    bias3 = jnp.tile(bn3b * shake, W).reshape(1, WCo)                         # (1, W*Cout)

    # 0/1 channel-scatter matrix for the shortcut concat.
    S = np.zeros((WCi, WCo), np.float32)
    jj = np.repeat(np.arange(W), Cin)
    cc = np.tile(np.arange(Cin), W)
    S[jj * Cin + cc, jj * Cout + cc] = 1.0
    S = jnp.asarray(S)

    # width-packed input, vertically zero-padded (horizontal pad lives in T1/T2).
    xvp = jnp.pad(x.reshape(N, H, WCi), ((0, 0), (1, 1), (0, 0)))  # (N, H+2, W*Cin)

    kernel = functools.partial(_shake_basic_block_kernel, mxu_dtype=mxu_dtype)
    out = pl.pallas_call(
        kernel,
        out_shape=jax.ShapeDtypeStruct((N, H, WCo), jnp.float32),
        grid=(N,),
        in_specs=[
            pl.BlockSpec((None, H + 2, WCi), lambda n: (n, 0, 0)),   # per-image input
            pl.BlockSpec((3, WCi, WCo), lambda n: (0, 0, 0)),        # conv1 taps (const)
            pl.BlockSpec((3, WCo, WCo), lambda n: (0, 0, 0)),        # conv2 taps (const)
            pl.BlockSpec((WCi, WCo), lambda n: (0, 0)),              # shortcut scatter
            pl.BlockSpec((H, WCo), lambda n: (0, 0)),                # conv1 bias map
            pl.BlockSpec((1, WCo), lambda n: (0, 0)),                # conv2 bias row
        ],
        out_specs=pl.BlockSpec((None, H, WCo), lambda n: (n, 0, 0)),
        scratch_shapes=[pltpu.VMEM((H + 2, WCo), mxu_dtype)],
        compiler_params=pltpu.CompilerParams(
            dimension_semantics=("parallel",)),
    )(xvp, T1.astype(mxu_dtype), T2.astype(mxu_dtype), S, bias1, bias3)

    out_nhwc = out.reshape(N, H, W, Cout)
    return jnp.transpose(out_nhwc, (0, 3, 1, 2))                    # NHWC -> NCHW


def reference_forward(x_nchw, w1, w2, s1, b1, s2, b2, s3, b3, p_shakedrop):
    """Pure-JAX reference (same inference semantics) for verification."""
    x = jnp.transpose(x_nchw, (0, 2, 3, 1)).astype(jnp.float32)
    Cin = x.shape[-1]
    Cout = w2.shape[-1]
    dn = ('NHWC', 'HWIO', 'NHWC')
    xbn = x * s1 + b1
    h1 = jax.lax.conv_general_dilated(xbn, w1, (1, 1), ((1, 1), (1, 1)),
                                      dimension_numbers=dn)
    h1 = jnp.maximum(h1 * s2 + b2, 0.0)
    h = jax.lax.conv_general_dilated(h1, w2, (1, 1), ((1, 1), (1, 1)),
                                     dimension_numbers=dn)
    h = h * s3 + b3
    h0 = jnp.pad(x, ((0, 0), (0, 0), (0, 0), (0, Cout - Cin)))
    out = h * (1.0 - p_shakedrop) + h0
    return jnp.transpose(out, (0, 3, 1, 2))


if __name__ == "__main__":
    # N=8 gives the pipeline several grid steps per core; W*Cout = 128 makes the
    # output rows exactly lane-dense.
    N, Cin, Cout, H, W = 8, 4, 8, 16, 16
    # Module default is p_shakedrop=1.0 (which zeroes the branch in eval mode);
    # use 0.5 here so the branch contributes to the output.
    p_shakedrop = 0.5

    key = jax.random.PRNGKey(0)
    ks = jax.random.split(key, 16)
    x_nchw = jax.random.normal(ks[0], (N, Cin, H, W), dtype=jnp.float32)

    def bn_params(kg, kb, km, kv, C):
        gamma = 1.0 + 0.1 * jax.random.normal(kg, (C,))
        beta = 0.1 * jax.random.normal(kb, (C,))
        mean = 0.1 * jax.random.normal(km, (C,))
        var = 0.5 + jax.random.uniform(kv, (C,))
        eps = 1e-5
        scale = gamma / jnp.sqrt(var + eps)
        shift = beta - mean * scale
        return scale.astype(jnp.float32), shift.astype(jnp.float32)

    s1, b1 = bn_params(ks[1], ks[2], ks[3], ks[4], Cin)
    s2, b2 = bn_params(ks[5], ks[6], ks[7], ks[8], Cout)
    s3, b3 = bn_params(ks[9], ks[10], ks[11], ks[12], Cout)
    w1 = (jax.random.normal(ks[13], (3, 3, Cin, Cout)) / jnp.sqrt(9.0 * Cin)).astype(jnp.float32)
    w2 = (jax.random.normal(ks[14], (3, 3, Cout, Cout)) / jnp.sqrt(9.0 * Cout)).astype(jnp.float32)

    ref = reference_forward(x_nchw, w1, w2, s1, b1, s2, b2, s3, b3, p_shakedrop)

    # --- f32 path: strict check against the f32 reference ---
    out = shake_basic_block(x_nchw, w1, w2, s1, b1, s2, b2, s3, b3,
                            stride=1, p_shakedrop=p_shakedrop,
                            mxu_dtype=jnp.float32)
    out = jax.block_until_ready(out)
    assert out.shape == (N, Cout, H, W), out.shape
    max_err = float(jnp.max(jnp.abs(out - ref)))
    assert max_err < 2e-3, f"f32 path mismatch vs reference: {max_err}"

    # --- bf16 storage / MXU-input path (perf-recommended): loose smoke check,
    #     bf16 operands with f32 accumulation vs a pure-f32 reference. ---
    out_bf16 = shake_basic_block(x_nchw, w1, w2, s1, b1, s2, b2, s3, b3,
                                 stride=1, p_shakedrop=p_shakedrop,
                                 mxu_dtype=jnp.bfloat16)
    out_bf16 = jax.block_until_ready(out_bf16)
    max_err_bf16 = float(jnp.max(jnp.abs(out_bf16 - ref)))
    assert max_err_bf16 < 0.15, f"bf16 path mismatch vs reference: {max_err_bf16}"

    print("KERNEL_OK")
</pallas_src>

<mosaic_0001>
module attributes {stable_mosaic.version = 11 : i64} {
  func.func @_shake_basic_block_kernel(%arg0: i32, %arg1: memref<1x18x64xf32, #tpu.memory_space<vmem>>, %arg2: memref<3x64x128xf32, #tpu.memory_space<vmem>>, %arg3: memref<3x128x128xf32, #tpu.memory_space<vmem>>, %arg4: memref<64x128xf32, #tpu.memory_space<vmem>>, %arg5: memref<16x128xf32, #tpu.memory_space<vmem>>, %arg6: memref<1x128xf32, #tpu.memory_space<vmem>>, %arg7: memref<1x16x128xf32, #tpu.memory_space<vmem>>, %arg8: memref<18x128xf32, #tpu.memory_space<vmem>>) attributes {dimension_semantics = [#tpu.dimension_semantics<parallel>], iteration_bounds = array<i64: 8>, scalar_prefetch = 0 : i64, scratch_operands = 1 : i64, tpu.core_type = #tpu.core_type<tc>, window_params = [{transform_indices = @transform_0, window_bounds = array<i64: 1, 18, 64>}, {pipeline_mode = #tpu.pipeline_mode<synchronous>, transform_indices = @transform_1, window_bounds = array<i64: 3, 64, 128>}, {pipeline_mode = #tpu.pipeline_mode<synchronous>, transform_indices = @transform_2, window_bounds = array<i64: 3, 128, 128>}, {pipeline_mode = #tpu.pipeline_mode<synchronous>, transform_indices = @transform_3, window_bounds = array<i64: 64, 128>}, {pipeline_mode = #tpu.pipeline_mode<synchronous>, transform_indices = @transform_4, window_bounds = array<i64: 16, 128>}, {pipeline_mode = #tpu.pipeline_mode<synchronous>, transform_indices = @transform_5, window_bounds = array<i64: 1, 128>}, {transform_indices = @transform_6, window_bounds = array<i64: 1, 16, 128>}]} {
    %c0 = arith.constant 0 : index
    %c0_0 = arith.constant 0 : index
    %0 = vector.load %arg5[%c0, %c0_0] : memref<16x128xf32, #tpu.memory_space<vmem>>, vector<16x128xf32>
    %c0_1 = arith.constant 0 : index
    %c0_2 = arith.constant 0 : index
    %c0_3 = arith.constant 0 : index
    %1 = vector.load %arg1[%c0_1, %c0_2, %c0_3] : memref<1x18x64xf32, #tpu.memory_space<vmem>>, vector<1x16x64xf32>
    %2 = vector.shape_cast %1 : vector<1x16x64xf32> to vector<16x64xf32>
    %c0_4 = arith.constant 0 : index
    %c0_5 = arith.constant 0 : index
    %c0_6 = arith.constant 0 : index
    %3 = vector.load %arg2[%c0_4, %c0_5, %c0_6] : memref<3x64x128xf32, #tpu.memory_space<vmem>>, vector<1x64x128xf32>
    %4 = vector.shape_cast %3 : vector<1x64x128xf32> to vector<64x128xf32>
    %cst = arith.constant dense<0.000000e+00> : vector<16x128xf32>
    %5 = tpu.matmul %2, %4, %cst {dimension_numbers = #tpu.dot_dimension_numbers<[1], [0], [0], [1], [0, 0, 1, 1], [], []>} : vector<16x64xf32>, vector<64x128xf32>, vector<16x128xf32> -> vector<16x128xf32>
    %6 = arith.addf %0, %5 : vector<16x128xf32>
    %c0_7 = arith.constant 0 : index
    %c1 = arith.constant 1 : index
    %c0_8 = arith.constant 0 : index
    %7 = vector.load %arg1[%c0_7, %c1, %c0_8] : memref<1x18x64xf32, #tpu.memory_space<vmem>>, vector<1x16x64xf32>
    %8 = vector.shape_cast %7 : vector<1x16x64xf32> to vector<16x64xf32>
    %c1_9 = arith.constant 1 : index
    %c0_10 = arith.constant 0 : index
    %c0_11 = arith.constant 0 : index
    %9 = vector.load %arg2[%c1_9, %c0_10, %c0_11] : memref<3x64x128xf32, #tpu.memory_space<vmem>>, vector<1x64x128xf32>
    %10 = vector.shape_cast %9 : vector<1x64x128xf32> to vector<64x128xf32>
    %cst_12 = arith.constant dense<0.000000e+00> : vector<16x128xf32>
    %11 = tpu.matmul %8, %10, %cst_12 {dimension_numbers = #tpu.dot_dimension_numbers<[1], [0], [0], [1], [0, 0, 1, 1], [], []>} : vector<16x64xf32>, vector<64x128xf32>, vector<16x128xf32> -> vector<16x128xf32>
    %12 = arith.addf %6, %11 : vector<16x128xf32>
    %c0_13 = arith.constant 0 : index
    %c2 = arith.constant 2 : index
    %c0_14 = arith.constant 0 : index
    %13 = vector.load %arg1[%c0_13, %c2, %c0_14] : memref<1x18x64xf32, #tpu.memory_space<vmem>>, vector<1x16x64xf32>
    %14 = vector.shape_cast %13 : vector<1x16x64xf32> to vector<16x64xf32>
    %c2_15 = arith.constant 2 : index
    %c0_16 = arith.constant 0 : index
    %c0_17 = arith.constant 0 : index
    %15 = vector.load %arg2[%c2_15, %c0_16, %c0_17] : memref<3x64x128xf32, #tpu.memory_space<vmem>>, vector<1x64x128xf32>
    %16 = vector.shape_cast %15 : vector<1x64x128xf32> to vector<64x128xf32>
    %cst_18 = arith.constant dense<0.000000e+00> : vector<16x128xf32>
    %17 = tpu.matmul %14, %16, %cst_18 {dimension_numbers = #tpu.dot_dimension_numbers<[1], [0], [0], [1], [0, 0, 1, 1], [], []>} : vector<16x64xf32>, vector<64x128xf32>, vector<16x128xf32> -> vector<16x128xf32>
    %18 = arith.addf %12, %17 : vector<16x128xf32>
    %cst_19 = arith.constant 0.000000e+00 : f32
    %19 = vector.broadcast %cst_19 : f32 to vector<16x128xf32>
    %20 = arith.maximumf %18, %19 : vector<16x128xf32>
    %cst_20 = arith.constant 0.000000e+00 : f32
    %21 = vector.broadcast %cst_20 : f32 to vector<1x128xf32>
    %c0_21 = arith.constant 0 : index
    %c0_22 = arith.constant 0 : index
    %22 = vector.load %arg8[%c0_21, %c0_22] : memref<18x128xf32, #tpu.memory_space<vmem>>, vector<1x128xf32>
    tpu.vector_store %arg8[%c0_21, %c0_22], %21 {strides = array<i32>} : memref<18x128xf32, #tpu.memory_space<vmem>>, vector<1x128xf32>,
    %c17 = arith.constant 17 : index
    %c0_23 = arith.constant 0 : index
    %23 = vector.load %arg8[%c17, %c0_23] : memref<18x128xf32, #tpu.memory_space<vmem>>, vector<1x128xf32>
    tpu.vector_store %arg8[%c17, %c0_23], %21 {strides = array<i32>} : memref<18x128xf32, #tpu.memory_space<vmem>>, vector<1x128xf32>,
    %c1_24 = arith.constant 1 : index
    %c0_25 = arith.constant 0 : index
    %24 = vector.load %arg8[%c1_24, %c0_25] : memref<18x128xf32, #tpu.memory_space<vmem>>, vector<16x128xf32>
    tpu.vector_store %arg8[%c1_24, %c0_25], %20 {strides = array<i32>} : memref<18x128xf32, #tpu.memory_space<vmem>>, vector<16x128xf32>,
    %c0_26 = arith.constant 0 : index
    %c0_27 = arith.constant 0 : index
    %25 = vector.load %arg8[%c0_26, %c0_27] : memref<18x128xf32, #tpu.memory_space<vmem>>, vector<16x128xf32>
    %c0_28 = arith.constant 0 : index
    %c0_29 = arith.constant 0 : index
    %c0_30 = arith.constant 0 : index
    %26 = vector.load %arg3[%c0_28, %c0_29, %c0_30] : memref<3x128x128xf32, #tpu.memory_space<vmem>>, vector<1x128x128xf32>
    %27 = vector.shape_cast %26 : vector<1x128x128xf32> to vector<128x128xf32>
    %cst_31 = arith.constant dense<0.000000e+00> : vector<16x128xf32>
    %28 = tpu.matmul %25, %27, %cst_31 {dimension_numbers = #tpu.dot_dimension_numbers<[1], [0], [0], [1], [0, 0, 1, 1], [], []>} : vector<16x128xf32>, vector<128x128xf32>, vector<16x128xf32> -> vector<16x128xf32>
    %c1_32 = arith.constant 1 : index
    %c0_33 = arith.constant 0 : index
    %29 = vector.load %arg8[%c1_32, %c0_33] : memref<18x128xf32, #tpu.memory_space<vmem>>, vector<16x128xf32>
    %c1_34 = arith.constant 1 : index
    %c0_35 = arith.constant 0 : index
    %c0_36 = arith.constant 0 : index
    %30 = vector.load %arg3[%c1_34, %c0_35, %c0_36] : memref<3x128x128xf32, #tpu.memory_space<vmem>>, vector<1x128x128xf32>
    %31 = vector.shape_cast %30 : vector<1x128x128xf32> to vector<128x128xf32>
    %cst_37 = arith.constant dense<0.000000e+00> : vector<16x128xf32>
    %32 = tpu.matmul %29, %31, %cst_37 {dimension_numbers = #tpu.dot_dimension_numbers<[1], [0], [0], [1], [0, 0, 1, 1], [], []>} : vector<16x128xf32>, vector<128x128xf32>, vector<16x128xf32> -> vector<16x128xf32>
    %33 = arith.addf %28, %32 : vector<16x128xf32>
    %c2_38 = arith.constant 2 : index
    %c0_39 = arith.constant 0 : index
    %34 = vector.load %arg8[%c2_38, %c0_39] : memref<18x128xf32, #tpu.memory_space<vmem>>, vector<16x128xf32>
    %c2_40 = arith.constant 2 : index
    %c0_41 = arith.constant 0 : index
    %c0_42 = arith.constant 0 : index
    %35 = vector.load %arg3[%c2_40, %c0_41, %c0_42] : memref<3x128x128xf32, #tpu.memory_space<vmem>>, vector<1x128x128xf32>
    %36 = vector.shape_cast %35 : vector<1x128x128xf32> to vector<128x128xf32>
    %cst_43 = arith.constant dense<0.000000e+00> : vector<16x128xf32>
    %37 = tpu.matmul %34, %36, %cst_43 {dimension_numbers = #tpu.dot_dimension_numbers<[1], [0], [0], [1], [0, 0, 1, 1], [], []>} : vector<16x128xf32>, vector<128x128xf32>, vector<16x128xf32> -> vector<16x128xf32>
    %38 = arith.addf %33, %37 : vector<16x128xf32>
    %c0_44 = arith.constant 0 : index
    %c1_45 = arith.constant 1 : index
    %c0_46 = arith.constant 0 : index
    %39 = vector.load %arg1[%c0_44, %c1_45, %c0_46] : memref<1x18x64xf32, #tpu.memory_space<vmem>>, vector<1x16x64xf32>
    %40 = vector.shape_cast %39 : vector<1x16x64xf32> to vector<16x64xf32>
    %c0_47 = arith.constant 0 : index
    %c0_48 = arith.constant 0 : index
    %41 = vector.load %arg4[%c0_47, %c0_48] : memref<64x128xf32, #tpu.memory_space<vmem>>, vector<64x128xf32>
    %cst_49 = arith.constant dense<0.000000e+00> : vector<16x128xf32>
    %42 = tpu.matmul %40, %41, %cst_49 {dimension_numbers = #tpu.dot_dimension_numbers<[1], [0], [0], [1], [0, 0, 1, 1], [], []>} : vector<16x64xf32>, vector<64x128xf32>, vector<16x128xf32> -> vector<16x128xf32>
    %c0_50 = arith.constant 0 : index
    %c0_51 = arith.constant 0 : index
    %43 = vector.load %arg6[%c0_50, %c0_51] : memref<1x128xf32, #tpu.memory_space<vmem>>, vector<1x128xf32>
    %44 = vector.broadcast %43 : vector<1x128xf32> to vector<16x128xf32>
    %45 = arith.addf %38, %44 : vector<16x128xf32>
    %46 = arith.addf %45, %42 : vector<16x128xf32>
    %c0_52 = arith.constant 0 : index
    %c0_53 = arith.constant 0 : index
    %c0_54 = arith.constant 0 : index
    %47 = vector.load %arg7[%c0_52, %c0_53, %c0_54] : memref<1x16x128xf32, #tpu.memory_space<vmem>>, vector<1x16x128xf32>
    %48 = vector.shape_cast %47 : vector<1x16x128xf32> to vector<16x128xf32>
    %49 = vector.shape_cast %46 : vector<16x128xf32> to vector<1x16x128xf32>
    tpu.vector_store %arg7[%c0_52, %c0_53, %c0_54], %49 {strides = array<i32>} : memref<1x16x128xf32, #tpu.memory_space<vmem>>, vector<1x16x128xf32>,
    return
  }
  func.func @transform_0(%arg0: i32) -> (i32, i32, i32) {
    %c0_i32 = arith.constant 0 : i32
    %c0_i32_0 = arith.constant 0 : i32
    %c0_i32_1 = arith.constant 0 : i32
    return %arg0, %c0_i32, %c0_i32_0 : i32, i32, i32
  }
  func.func @transform_1(%arg0: i32) -> (i32, i32, i32) {
    %c0_i32 = arith.constant 0 : i32
    %c0_i32_0 = arith.constant 0 : i32
    %c0_i32_1 = arith.constant 0 : i32
    %c0_i32_2 = arith.constant 0 : i32
    return %c0_i32, %c0_i32_0, %c0_i32_1 : i32, i32, i32
  }
  func.func @transform_2(%arg0: i32) -> (i32, i32, i32) {
    %c0_i32 = arith.constant 0 : i32
    %c0_i32_0 = arith.constant 0 : i32
    %c0_i32_1 = arith.constant 0 : i32
    %c0_i32_2 = arith.constant 0 : i32
    return %c0_i32, %c0_i32_0, %c0_i32_1 : i32, i32, i32
  }
  func.func @transform_3(%arg0: i32) -> (i32, i32) {
    %c0_i32 = arith.constant 0 : i32
    %c0_i32_0 = arith.constant 0 : i32
    %c0_i32_1 = arith.constant 0 : i32
    return %c0_i32, %c0_i32_0 : i32, i32
  }
  func.func @transform_4(%arg0: i32) -> (i32, i32) {
    %c0_i32 = arith.constant 0 : i32
    %c0_i32_0 = arith.constant 0 : i32
    %c0_i32_1 = arith.constant 0 : i32
    return %c0_i32, %c0_i32_0 : i32, i32
  }
  func.func @transform_5(%arg0: i32) -> (i32, i32) {
    %c0_i32 = arith.constant 0 : i32
    %c0_i32_0 = arith.constant 0 : i32
    %c0_i32_1 = arith.constant 0 : i32
    return %c0_i32, %c0_i32_0 : i32, i32
  }
  func.func @transform_6(%arg0: i32) -> (i32, i32, i32) {
    %c0_i32 = arith.constant 0 : i32
    %c0_i32_0 = arith.constant 0 : i32
    %c0_i32_1 = arith.constant 0 : i32
    return %arg0, %c0_i32, %c0_i32_0 : i32, i32, i32
  }
}

</mosaic_0001>

<bundles_post_ra>
// kernel: tpu_custom_call.1
= control target key start
LH: loop header
LB: loop body
LE: loop exit
PB: predicated region body
PF: predicated region fallthrough
CT: control target
= control target key end

     0   :  { %11 = vsyncpa [#allocation4], 0  ;;  %s1125_s0 = inlined_call_operand.vmem [shape: f32[8,18,64], index: 0, kind: input, shape index: {}]   ;;  %s1126_s1 = inlined_call_operand.vmem [shape: f32[3,64,128], index: 1, kind: input, shape index: {}]   ;;  %s1127_s2 = inlined_call_operand.hbm [shape: f32[3,128,128], index: 2, kind: input, shape index: {}]   ;;  %s1128_s3 = inlined_call_operand.vmem [shape: f32[64,128], index: 3, kind: input, shape index: {}]   ;;  %s1129_s4 = inlined_call_operand.vmem [shape: f32[16,128], index: 4, kind: input, shape index: {}]   ;;  %s1130_s5 = inlined_call_operand.vmem [shape: f32[1,128], index: 5, kind: input, shape index: {}]   ;;  %s1131_s6 = inlined_call_operand.hbm [shape: f32[8,16,128], index: 6, kind: output, shape index: {}]  }
   0x1   :  { %12 = vsyncpa [#allocation5], 0 }
   0x2   :  { %14 = vsyncpa [#allocation5 + $0x1], 0  ;;  %s901_s21 = smov 0   ;;  %s903_s22 = smov 0  }
   0x3   :  { %s905_s23 = smov 0   ;;  %s907_s24 = smov 0  }
   0x4 LB: > { %s922_s25 = sadd.s32 4294967295, %s858_s24   ;;  %s667_s26 = sadd.s32 4294967294, %s858_s24   ;;  %s858_s24 = sphi %s907_s24, %s1137_s24   ;;  %s854_s23 = sphi %s905_s23, %s1136_s23   ;;  %s850_s22 = sphi %s903_s22, %s1135_s22   ;;  %s846_s21 = sphi %s901_s21, %s1134_s21  }
   0x5   : > { %s926_s27 = sadd.s32 1, %s858_s24   ;;  %s158_s28 = sadd.s32 1, %s854_s23 }
   0x6   : > { %s155_s29 = ssub.s32 %s858_s24, %s926_s27  ;;  %p168_p0 = scmp.ne.s32.totalorder %s854_s23, %s850_s22 }
   0x7   : > { %p156_p1 = scmp.eq.s32.totalorder %s155_s29, 0  ;;  %p169_p2 = scmp.eq.s32.totalorder %s922_s25, 7 }
   0x8   : > { %p174_p3 = scmp.ne.s32.totalorder %s850_s22, %s846_s21  ;;  %p175_p4 = scmp.eq.s32.totalorder %s667_s26, 7 }
   0x9   : > { %s937_s30 = scalar_select %p156_p1, %s854_s23, %s158_s28  }
   0xa   : > { %p939_p5 = por %p169_p2, %p168_p0  ;;  %p943_p6 = por %p175_p4, %p174_p3 }
   0xb   : > { %p668_p7 = scmp.ge.s32.totalorder %s858_s24, 1  ;;  %p182_p8 = scmp.lt.s32.totalorder %s858_s24, 9 }
   0xc   : > { %p720_p9 = scmp.eq.s32.totalorder %s922_s25, 0  ;;  %s196_s11 = sshll.u32 %s1127_s2, 4  ;;  %s197_s11 = int_to_ptr.hbm [resolvable:$true] %s196_s11 }
   0xd   : > { %p183_p10 = pnand %p668_p7, %p182_p8  ;;  %s860_s12 = smov [#allocation3]  }
   0xe   : > { %s198_s13 = sshll.u32 %s860_s12, 4  ;;  %s861_s14 = smov 128   ;;  %s199_s13 = int_to_ptr.vmem [resolvable:$true] %s198_s13 }
   0xf   : > { %p712_p11 = pneg %p183_p10  ;;  %s862_s15 = smov 8  }
  0x10   : > { %231 = sbr.rel (%p183_p10) target bundleno = 335 (0x14f), region = 44 }
  0x11   : > { %p713_p12 = pnand %p720_p9, %p712_p11 }
  0x13   : > { %715 = dma.hbm_to_vmem [thread:$0]  (!%p713_p12), %s197_s11, 6144, %s199_s13, [#allocation4], %s861_s14, %s861_s14, %s862_s15  }
  0x15   : > { %837 = dma.done.wait (%p720_p9), [#allocation4], 6144  }
  0x16   : > { %839 = vsyncadd (%p720_p9), [#allocation4], 4294961152  ;;  %p262_p13 = scmp.lt.s32.totalorder %s922_s25, 7  ;;  %v694_v0 = vld [vmem:[%s1126_s1 + $0xb8] sm:$0xff]  ;;  %v693_v2 = vld [vmem:[%s1126_s1 + $0xb0] sm:$0xff]  ;;  %vm279_vm0 = vcmask 523264  }
  0x17   : > { %v278_v1 = vld [vmem:[%s1126_s1 + $0x38] sm:$0xff]  ;;  %378 = vmatpush.msra.mxu2 %v694_v0  ;;  %v277_v3 = vld [vmem:[%s1126_s1 + $0x30] sm:$0xff]  ;;  %v692_v5 = vld [vmem:[%s1126_s1 + $0xa8] sm:$0xff]  ;;  %s259_s14 = sand.u32 1, %s850_s22   ;;  %s704_s20 = sshll.u32 %s922_s25, 4 }
  0x18   : > { %294 = vmatpush.msra.mxu0 %v278_v1  ;;  %v684_v4 = vld [vmem:[%s1126_s1 + $0x78] sm:$0xff]  ;;  %v276_v6 = vld [vmem:[%s1126_s1 + $0x28] sm:$0xff]  ;;  %v683_v7 = vld [vmem:[%s1126_s1 + $0x70] sm:$0xff]  ;;  %s263_s17 = scalar_select %p262_p13, %s922_s25, 7 }
  0x19   : > { %336 = vmatpush.msra.mxu1 %v684_v4  ;;  %379 = vmatpush.msra.mxu2 %v693_v2  ;;  %v682_v8 = vld [vmem:[%s1126_s1 + $0x68] sm:$0xff]  ;;  %v691_v9 = vld [vmem:[%s1126_s1 + $0xa0] sm:$0xff]  ;;  %v690_v12 = vld [vmem:[%s1126_s1 + $0x98] sm:$0xff]  ;;  %s673_s19 = sshll.u32 %s259_s14, 4  ;;  %s589_s29 = scalar_lea.hbm %s1131_s6, %s704_s20 }
  0x1a   : > { %295 = vmatpush.msra.mxu0 %v277_v3  ;;  %v275_v10 = vld [vmem:[%s1126_s1 + $0x20] sm:$0xff]  ;;  %v274_v13 = vld [vmem:[%s1126_s1 + $0x18] sm:$0xff]  ;;  %s705_s15 = smul.u32 24, %s263_s17  ;;  %v689_v15 = vld [vmem:[%s1126_s1 + $0x90] sm:$0xff]  ;;  %s592_s17 = sshll.u32 %s589_s29, 4  ;;  %s593_s17 = int_to_ptr.hbm [resolvable:$true] %s592_s17 }
  0x1b   : > { %337 = vmatpush.msra.mxu1 %v683_v7  ;;  %380 = vmatpush.msra.mxu2 %v692_v5  ;;  %v681_v11 = vld [vmem:[%s1126_s1 + $0x60] sm:$0xff]  ;;  %v680_v14 = vld [vmem:[%s1126_s1 + $0x58] sm:$0xff]  ;;  %v273_v16 = vld [vmem:[%s1126_s1 + $0x10] sm:$0xff]  ;;  %s578_s25 = scalar_lea.sflag [#allocation5], %s259_s14  ;;  %s806_s10 = sshra.s32 %s593_s17, 4  ;;  %s807_s10 = int_to_ptr.hbm [resolvable:$true] %s806_s10 }
  0x1c   : > { %296 = vmatpush.msra.mxu0 %v276_v6  ;;  %v679_v17 = vld [vmem:[%s1126_s1 + $0x50] sm:$0xff]  ;;  %v688_v18 = vld [vmem:[%s1126_s1 + $0x88] sm:$0xff]  ;;  %s1024_s16 = scalar_lea.vmem %s1125_s0, %s705_s15  ;;  %v687_v23 = vld [vmem:[%s1126_s1 + $0x80] sm:$0xff]  ;;  %v863_v6 = vmov 0.0   ;;  %s261_s15 = scalar_lea.vmem [#allocation6], %s673_s19 }
  0x1d   : > { %338 = vmatpush.msra.mxu1 %v682_v8  ;;  %381 = vmatpush.msra.mxu2 %v691_v9  ;;  %v272_v19 = vld [vmem:[%s1126_s1 + $0x8] sm:$0xff]  ;;  %v437_v20 = vld [vmem:[#allocation3 + $0xf8] sm:$0xff]  ;;  %v271_v24 = vld [vmem:[%s1126_s1] sm:$0xff]  ;;  %397 = vst [vmem:[#allocation2] sm:$0x1] %v863_v6  ;;  %s590_s9 = sshll.u32 %s261_s15, 4  ;;  %p813_p3 = scmp.lt.s32.totalorder %s807_s10, %s1131_s6  ;;  %s591_s9 = int_to_ptr.vmem [resolvable:$true] %s590_s9 }
  0x1e   : > { %297 = vmatpush.msra.mxu0 %v275_v10  ;;  %v678_v21 = vld [vmem:[%s1126_s1 + $0x48] sm:$0xff]  ;;  %438 = vmatpush.msra.mxu3 %v437_v20  ;;  %v269_v26 = vld [vmem:[%s1024_s16] sm:$0xff]  ;;  %v418_v28 = vld [vmem:[#allocation3 + $0x78] sm:$0xff]  ;;  %398 = vst [vmem:[#allocation2 + $0x11] sm:$0x1] %v863_v6  ;;  %s808_s11 = scalar_lea.hbm %s807_s10, 16 }
  0x1f   : > { %339 = vmatpush.msra.mxu1 %v681_v11  ;;  %382 = vmatpush.msra.mxu2 %v690_v12  ;;  %v436_v22 = vld [vmem:[#allocation3 + $0xf0] sm:$0xff]  ;;  %v677_v27 = vld [vmem:[%s1126_s1 + $0x40] sm:$0xff]  ;;  %v502_v32 = vld [vmem:[#allocation3 + $0x178] sm:$0xff]  ;;  %p809_p0 = scmp.ne.s32.totalorder %s807_s10, %s808_s11 }
  0x20   : > { %298 = vmatpush.msra.mxu0 %v274_v13  ;;  %v353_v25 = vld [vmem:[%s1024_s16 + $0x2] sm:$0xff]  ;;  %439 = vmatpush.msra.mxu3 %v436_v22  ;;  %v434_v33 = vld [vmem:[#allocation3 + $0xe0] sm:$0xff]  ;;  %v433_v36 = vld [vmem:[#allocation3 + $0xd8] sm:$0xff] }
  0x21   : > { %340 = vmatpush.msra.mxu1 %v680_v14  ;;  %383 = vmatpush.msra.mxu2 %v689_v15  ;;  %v1041_v29 = vld [vmem:[%s1024_s16 + $0x1] sm:$0xff]  ;;  %v415_v37 = vld [vmem:[#allocation3 + $0x60] sm:$0xff]  ;;  %v354_v39 = vld [vmem:[%s1024_s16 + $0xa] sm:$0xff]  ;;  %p810_p1 = pnand %p809_p0, %p939_p5 }
  0x22   : > { %299 = vmatpush.msra.mxu0 %v273_v16  ;;  %v435_v30 = vld [vmem:[#allocation3 + $0xe8] sm:$0xff]  ;;  %v417_v31 = vld [vmem:[#allocation3 + $0x70] sm:$0xff]  ;;  %v414_v41 = vld [vmem:[#allocation3 + $0x58] sm:$0xff] }
  0x23   : > { %341 = vmatpush.msra.mxu1 %v679_v17  ;;  %384 = vmatpush.msra.mxu2 %v688_v18  ;;  %v416_v34 = vld [vmem:[#allocation3 + $0x68] sm:$0xff]  ;;  %v501_v35 = vld [vmem:[#allocation3 + $0x170] sm:$0xff]  ;;  %v430_v47 = vld [vmem:[#allocation3 + $0xc0] sm:$0xff]  ;;  %p811_p2 = pneg %p810_p1 }
  0x24   : > { %300 = vmatpush.msra.mxu0 %v272_v19  ;;  %440 = vmatpush.msra.mxu3 %v435_v30  ;;  %v500_v38 = vld [vmem:[#allocation3 + $0x168] sm:$0xff]  ;;  %v270_v40 = vld [vmem:[%s1024_s16 + $0x8] sm:$0xff]  ;;  %v429_v48 = vld [vmem:[#allocation3 + $0xb8] sm:$0xff] }
  0x25   : > { %342 = vmatpush.msra.mxu1 %v678_v21  ;;  %385 = vmatpush.msra.mxu2 %v687_v23  ;;  %v432_v42 = vld [vmem:[#allocation3 + $0xd0] sm:$0xff]  ;;  %v431_v45 = vld [vmem:[#allocation3 + $0xc8] sm:$0xff]  ;;  %v411_v51 = vld [vmem:[#allocation3 + $0x40] sm:$0xff] }
  0x26   : > { %301 = vmatpush.msra.mxu0 %v271_v24  ;;  %695 = vmatmul.msk.f32.vlgmr.msra.gmra.mxu2 %vm279_vm0, %v353_v25  ;;  %v1050_v43 = vld [vmem:[%s1024_s16 + $0x9] sm:$0xff]  ;;  %v412_v46 = vld [vmem:[#allocation3 + $0x48] sm:$0xff]  ;;  %v499_v52 = vld [vmem:[#allocation3 + $0x160] sm:$0xff]  ;;  %s812_s16 = scalar_lea.hbm %s1131_s6, 128 }
  0x27   : > { %675 = vmatmul.msk.f32.vlgmr.msra.gmra.mxu0 %vm279_vm0, %v269_v26  ;;  %343 = vmatpush.msra.mxu1 %v677_v27  ;;  %v413_v44 = vld [vmem:[#allocation3 + $0x50] sm:$0xff]  ;;  %v427_v50 = vld [vmem:[#allocation3 + $0xa8] sm:$0xff]  ;;  %v426_v53 = vld [vmem:[#allocation3 + $0xa0] sm:$0xff]  ;;  %p814_p4 = scmp.lt.s32.totalorder %s812_s16, %s808_s11 }
  0x28   : > { %461 = vmatpush.msrb.mxu0 %v418_v28  ;;  %685 = vmatmul.msk.f32.vlgmr.msra.gmra.mxu1 %vm279_vm0, %v1041_v29  ;;  %v428_v49 = vld [vmem:[#allocation3 + $0xb0] sm:$0xff]  ;;  %v410_v54 = vld [vmem:[#allocation3 + $0x38] sm:$0xff]  ;;  %v408_v60 = vld [vmem:[#allocation3 + $0x28] sm:$0xff] }
  0x29   : > { %503 = vmatpush.msrb.mxu1 %v502_v32  ;;  %441 = vmatpush.msra.mxu3 %v434_v33  ;;  %v498_v55 = vld [vmem:[#allocation3 + $0x158] sm:$0xff]  ;;  %v409_v57 = vld [vmem:[#allocation3 + $0x30] sm:$0xff]  ;;  %v496_v61 = vld [vmem:[#allocation3 + $0x148] sm:$0xff]  ;;  %p815_p7 = por %p814_p4, %p813_p3 }
  0x2a   : > { %462 = vmatpush.msrb.mxu0 %v417_v31  ;;  %v425_v56 = vld [vmem:[#allocation3 + $0x98] sm:$0xff]  ;;  %v497_v58 = vld [vmem:[#allocation3 + $0x150] sm:$0xff]  ;;  %v423_v62 = vld [vmem:[#allocation3 + $0x88] sm:$0xff] }
  0x2b   : > { %504 = vmatpush.msrb.mxu1 %v501_v35  ;;  %442 = vmatpush.msra.mxu3 %v433_v36  ;;  %v424_v59 = vld [vmem:[#allocation3 + $0x90] sm:$0xff]  ;;  %v537_v63 = vld [vmem:[%s1128_s3 + $0x38] sm:$0xff]  ;;  %v536_v3 = vld [vmem:[%s1128_s3 + $0x30] sm:$0xff]  ;;  %p816_p8 = pnand %p815_p7, %p811_p2 }
  0x2c   : > { %463 = vmatpush.msrb.mxu0 %v416_v34  ;;  %v407_v0 = vld [vmem:[#allocation3 + $0x20] sm:$0xff]  ;;  %552 = vmatpush.msrb.mxu2 %v537_v63  ;;  %v406_v4 = vld [vmem:[#allocation3 + $0x18] sm:$0xff]  ;;  %v535_v7 = vld [vmem:[%s1128_s3 + $0x28] sm:$0xff] }
  0x2d   : > { %505 = vmatpush.msrb.mxu1 %v500_v38  ;;  %443 = vmatpush.msra.mxu3 %v432_v42  ;;  %v495_v1 = vld [vmem:[#allocation3 + $0x140] sm:$0xff]  ;;  %v494_v5 = vld [vmem:[#allocation3 + $0x138] sm:$0xff]  ;;  %v405_v8 = vld [vmem:[#allocation3 + $0x10] sm:$0xff] }
  0x2e   : > { %464 = vmatpush.msrb.mxu0 %v415_v37  ;;  %696 = vmatmul.msk.f32.gmra.mxu2 %vm279_vm0, %v354_v39  ;;  %v422_v2 = vld [vmem:[#allocation3 + $0x80] sm:$0xff]  ;;  %v493_v9 = vld [vmem:[#allocation3 + $0x130] sm:$0xff]  ;;  %v534_v10 = vld [vmem:[%s1128_s3 + $0x20] sm:$0xff] }
  0x2f   : > { %676 = vmatmul.msk.f32.gmra.mxu0 %vm279_vm0, %v270_v40  ;;  %444 = vmatpush.msra.mxu3 %v431_v45  ;;  %v404_v11 = vld [vmem:[#allocation3 + $0x8] sm:$0xff]  ;;  %v533_v13 = vld [vmem:[%s1128_s3 + $0x18] sm:$0xff]  ;;  %v532_v16 = vld [vmem:[%s1128_s3 + $0x10] sm:$0xff] }
  0x30   : > { %465 = vmatpush.msrb.mxu0 %v414_v41  ;;  %686 = vmatmul.msk.f32.gmra.mxu1 %vm279_vm0, %v1050_v43  ;;  %v492_v12 = vld [vmem:[#allocation3 + $0x128] sm:$0xff]  ;;  %v403_v14 = vld [vmem:[#allocation3] sm:$0xff]  ;;  %v490_v17 = vld [vmem:[#allocation3 + $0x118] sm:$0xff] }
  0x31   : > { %445 = vmatpush.msra.mxu3 %v430_v47  ;;  %506 = vmatpush.msrb.mxu1 %v499_v52  ;;  %v491_v15 = vld [vmem:[#allocation3 + $0x120] sm:$0xff]  ;;  %v531_v18 = vld [vmem:[%s1128_s3 + $0x8] sm:$0xff]  ;;  %v530_v20 = vld [vmem:[%s1128_s3] sm:$0xff] }
  0x32   : > { %466 = vmatpush.msrb.mxu0 %v413_v44  ;;  %553 = vmatpush.msrb.mxu2 %v536_v3  ;;  %v489_v19 = vld [vmem:[#allocation3 + $0x110] sm:$0xff]  ;;  %v488_v21 = vld [vmem:[#allocation3 + $0x108] sm:$0xff]  ;;  %v487_v22 = vld [vmem:[#allocation3 + $0x100] sm:$0xff] }
  0x33   : > { %446 = vmatpush.msra.mxu3 %v429_v48  ;;  %507 = vmatpush.msrb.mxu1 %v498_v55  ;;  %v267_v23 = vld [vmem:[%s1129_s4] sm:$0xff]  ;;  %v268_v30 = vld [vmem:[%s1129_s4 + $0x8] sm:$0xff] }
  0x34   : > { %467 = vmatpush.msrb.mxu0 %v412_v46  ;;  %554 = vmatpush.msrb.mxu2 %v535_v7  ;;  %v761_v46 = vld [vmem:[%s1130_s5] ss:$0 sm:$0xff] }
  0x35   : > { %447 = vmatpush.msra.mxu3 %v428_v49  ;;  %508 = vmatpush.msrb.mxu1 %v497_v58 }
  0x36   : > { %468 = vmatpush.msrb.mxu0 %v411_v51  ;;  %555 = vmatpush.msrb.mxu2 %v534_v10 }
  0x37   : > { %448 = vmatpush.msra.mxu3 %v427_v50  ;;  %509 = vmatpush.msrb.mxu1 %v496_v61 }
  0x38   : > { %469 = vmatpush.msrb.mxu0 %v410_v54  ;;  %556 = vmatpush.msrb.mxu2 %v533_v13 }
  0x39   : > { %449 = vmatpush.msra.mxu3 %v426_v53  ;;  %510 = vmatpush.msrb.mxu1 %v495_v1 }
  0x3a   : > { %470 = vmatpush.msrb.mxu0 %v409_v57  ;;  %557 = vmatpush.msrb.mxu2 %v532_v16 }
  0x3b   : > { %450 = vmatpush.msra.mxu3 %v425_v56  ;;  %511 = vmatpush.msrb.mxu1 %v494_v5 }
  0x3c   : > { %471 = vmatpush.msrb.mxu0 %v408_v60  ;;  %558 = vmatpush.msrb.mxu2 %v531_v18 }
  0x3d   : > { %451 = vmatpush.msra.mxu3 %v424_v59  ;;  %512 = vmatpush.msrb.mxu1 %v493_v9 }
  0x3e   : > { %472 = vmatpush.msrb.mxu0 %v407_v0  ;;  %559 = vmatpush.msrb.mxu2 %v530_v20 }
  0x3f   : > { %452 = vmatpush.msra.mxu3 %v423_v62  ;;  %513 = vmatpush.msrb.mxu1 %v492_v12 }
  0x40   : > { %473 = vmatpush.msrb.mxu0 %v406_v4  ;;  %697 = vmatmul.msk.f32.vlgmr.msrb.gmra.mxu2 %vm279_vm0, %v1041_v29 }
  0x41   : > { %453 = vmatpush.msra.mxu3 %v422_v2  ;;  %514 = vmatpush.msrb.mxu1 %v491_v15 }
  0x42   : > { %474 = vmatpush.msrb.mxu0 %v405_v8 }
  0x43   : > { %515 = vmatpush.msrb.mxu1 %v490_v17 }
  0x44   : > { %475 = vmatpush.msrb.mxu0 %v404_v11 }
  0x45   : > { %516 = vmatpush.msrb.mxu1 %v489_v19 }
  0x46   : > { %476 = vmatpush.msrb.mxu0 %v403_v14 }
  0x47   : > { %517 = vmatpush.msrb.mxu1 %v488_v21 }
  0x48   : > { %698 = vmatmul.msk.f32.gmra.mxu2 %vm279_vm0, %v1050_v43 }
  0x49   : > { %518 = vmatpush.msrb.mxu1 %v487_v22 }
  0xa4   : > { %v303_v24 = vpop.f32.mrf.mxu0 }
  0xa5   : > { %v309_v25 = vadd.f32 %v303_v24, %v267_v23  ;;  %v345_v26 = vpop.f32.mrf.mxu1 }
  0xa7   : > { %v351_v27 = vadd.f32 %v345_v26, %v309_v25 }
  0xa9   : > { %v387_v28 = vpop.f32.mrf.mxu2 }
  0xaa   : > { %v393_v31 = vadd.f32 %v387_v28, %v351_v27 }
  0xac   : > { %v306_v32 = vpop.f32.mrf.mxu0  ;;  %v395_v29 = vmax.f32 %v393_v31, 0.0 }
  0xad   : > { %v310_v33 = vadd.f32 %v306_v32, %v268_v30  ;;  %v348_v34 = vpop.f32.mrf.mxu1 }
  0xae   : > { %399 = vst [vmem:[#allocation2 + $0x1] sm:$0xff] %v395_v29  ;;  %454 = vmatmul.f32.vlgmr.msra.gmra.mxu3 %v395_v29 }
  0xaf   : > { %v352_v35 = vadd.f32 %v348_v34, %v310_v33 }
  0xb1   : > { %v390_v36 = vpop.f32.mrf.mxu2 }
  0xb2   : > { %v394_v37 = vadd.f32 %v390_v36, %v352_v35 }
  0xb4   : > { %v396_v38 = vmax.f32 %v394_v37, 0.0 }
  0xb5   : > { %v401_v39 = vld [vmem:[#allocation2] sm:$0xff] }
  0xb6   : > { %400 = vst [vmem:[#allocation2 + $0x9] sm:$0xff] %v396_v38  ;;  %477 = vmatmul.f32.vlgmr.msrb.gmra.mxu0 %v401_v39  ;;  %457 = vmatmul.f32.gmra.mxu3 %v396_v38 }
  0xbd   : > { %v402_v40 = vld [vmem:[#allocation2 + $0x8] sm:$0xff] }
  0xbe   : > { %v484_v41 = vld [vmem:[#allocation2 + $0x2] sm:$0xff]  ;;  %480 = vmatmul.f32.gmra.mxu0 %v402_v40  ;;  %v485_v42 = vld [vmem:[#allocation2 + $0xa] sm:$0xff] }
  0xbf   : > { %519 = vmatmul.f32.vlgmr.msrb.gmra.mxu1 %v484_v41 }
  0xc3   : > { %v561_v48 = vpop.f32.mrf.mxu2 }
  0xc7   : > { %522 = vmatmul.f32.gmra.mxu1 %v485_v42 }
  0xcb   : > { %v564_v57 = vpop.f32.mrf.mxu2 }
 0x131   : > { %v455_v44 = vpop.f32.mrf.mxu3 }
 0x133   : > { %v478_v43 = vpop.f32.mrf.mxu0 }
 0x134   : > { %v479_v45 = vadd.f32 %v478_v43, %v455_v44 }
 0x139   : > { %v458_v53 = vpop.f32.mrf.mxu3 }
 0x13b   : > { %v481_v51 = vpop.f32.mrf.mxu0 }
 0x13c   : > { %v520_v47 = vpop.f32.mrf.mxu1  ;;  %v482_v54 = vadd.f32 %v481_v51, %v458_v53 }
 0x13d   : > { %v526_v49 = vadd.f32 %v520_v47, %v479_v45 }
 0x13f   : > { %v571_v50 = vadd.f32 %v761_v46, %v526_v49 }
 0x141   : > { %v573_v52 = vadd.f32 %v571_v50, %v561_v48 }
 0x143   : > { %575 = vst [vmem:[%s261_s15] sm:$0xff] %v573_v52 }
 0x144   : > { %v523_v55 = vpop.f32.mrf.mxu1 }
 0x145   : > { %v527_v56 = vadd.f32 %v523_v55, %v482_v54 }
 0x147   : > { %v572_v58 = vadd.f32 %v761_v46, %v527_v56 }
 0x149   : > { %v574_v59 = vadd.f32 %v572_v58, %v564_v57 }
 0x14b   : > { %576 = vst [vmem:[%s261_s15 + $0x8] sm:$0xff] %v574_v59 }
 0x14c   : > { %819 = shalt.err (!%p816_p8)
}
 0x14d   : > { %s864_s14 = smov 128   ;;  %s865_s20 = smov 8  }
 0x14e   : > { %710 = dma.vmem_to_hbm [thread:$0]  (%p939_p5), %s591_s9, 256, %s593_s17, %s578_s25, %s864_s14, %s864_s14, %s865_s20  }
 0x14f PF: > { %p722_p9 = scmp.ge.s32.totalorder %s858_s24, 2  ;;  %s607_s26 = sand.u32 1, %s846_s21  }
 0x150   : > { %s608_s28 = scalar_lea.sflag [#allocation5], %s607_s26 }
 0x151   : > { %p717_p10 = pnand %p722_p9, %p943_p6 }
 0x153   : > { %p718_p11 = pneg %p717_p10 }
 0x155   : > { %841 = dma.done.wait (%p718_p11), %s608_s28, 256  }
 0x156   : > { %843 = vsyncadd (%p718_p11), %s608_s28, 4294967040  ;;  %p17_p12 = scmp.ge.s32.totalorder %s926_s27, 10   ;;  %s1134_s21 = smov %s850_s22 }
 0x157   : > { %s1135_s22 = smov %s854_s23  ;;  %s1136_s23 = smov %s937_s30 }
 0x158   : > { %s1137_s24 = smov %s926_s27  ;;  %19 = sbr.rel (!%p17_p12) target bundleno = 4 (0x4), region = 88 }
 0x15d   :  { %614 = vsyncpa [#allocation4], 1 }
 0x15e   :  { %616 = vsyncpa [#allocation4 + $0x1], 1 }
 0x15f   :  { %617 = vsyncpa [#allocation5], 1 }
 0x160   :  { %619 = vsyncpa [#allocation5 + $0x1], 1 }

</bundles_post_ra>
